<compile_context>
chip_gen: v5e
topology: v5e:2x2
jax: 0.10.0
libtpu: 0.0.40
codegen_flags: <defaults>
</compile_context>

<pallas_src>
import functools
import math

import jax
import jax.numpy as jnp
import numpy as np
from jax.experimental import pallas as pl
from jax.experimental.pallas import tpu as pltpu

NUM_HEADS = 8
LN_EPS = 1e-5
NEG_BIAS = -1e9   # finite mask bias (PyTorch uses -inf and NaNs on fully-masked rows)


def _cross_attention_kernel(*refs, bt, lq, s_len, e, fuse_kv, has_mask):
    E = e
    H = NUM_HEADS
    hd = E // H

    it = iter(refs)
    q_ref = next(it)
    k_ref = next(it)
    v_ref = None if fuse_kv else next(it)
    mask_ref = next(it) if has_mask else None
    wq_ref = next(it)
    wkv_ref = next(it)
    wo_ref = next(it)          # (H, hd, E) bf16
    vec_ref = next(it)         # (6, E) f32
    o_ref = next(it)

    xq = q_ref[...]            # (bt*lq, E) f32, also the residual

    bq = vec_ref[0:1, :]       # pre-scaled by 1/sqrt(hd) on host
    bk = vec_ref[1:2, :]
    bv = vec_ref[2:3, :]
    bo = vec_ref[3:4, :]
    ln_w = vec_ref[4:5, :]
    ln_b = vec_ref[5:6, :]

    # ---- in-projections: big MXU matmuls, bf16 inputs / f32 accumulation ----
    q = jnp.dot(xq.astype(jnp.bfloat16), wq_ref[...],
                preferred_element_type=jnp.float32) + bq            # (bt*lq, E), pre-scaled

    if fuse_kv:
        # key tensor == value tensor: one (bt*S, E) @ (E, 2E) matmul covers K and V.
        kv = jnp.dot(k_ref[...], wkv_ref[...],
                     preferred_element_type=jnp.float32)            # (bt*S, 2E)
        k = kv[:, :E] + bk
        v = kv[:, E:] + bv
    else:
        k = jnp.dot(k_ref[...], wkv_ref[:, :E],
                    preferred_element_type=jnp.float32) + bk
        v = jnp.dot(v_ref[...], wkv_ref[:, E:],
                    preferred_element_type=jnp.float32) + bv

    q_b = q.astype(jnp.bfloat16)
    k_b = k.astype(jnp.bfloat16)
    v_b = v.astype(jnp.bfloat16)

    # ---- head split: heads stacked along the leading axis (index = h*bt + b) ----
    def head_stack(x, rows):
        parts = [x[:, h * hd:(h + 1) * hd].reshape(bt, rows, hd) for h in range(H)]
        return jnp.concatenate(parts, axis=0)          # (H*bt, rows, hd)

    q_hb = head_stack(q_b, lq)                         # (H*bt, lq, hd)
    k_hb = head_stack(k_b, s_len)                      # (H*bt, s,  hd)
    v_hb = head_stack(v_b, s_len)                      # (H*bt, s,  hd)

    # ---- one batched contraction over (head, batch) for the scores ----
    s = jnp.einsum("bqd,bkd->bqk", q_hb, k_hb,
                   preferred_element_type=jnp.float32)              # (H*bt, lq, s) f32

    if has_mask:
        # grid-invariant (B,1,S) bias lives in VMEM once; slice this block's bt batches.
        b0 = pl.multiple_of(pl.program_id(0) * bt, bt)
        mask = mask_ref[pl.ds(b0, bt), :, :]                        # (bt, 1, s)
        s = (s.reshape(H, bt, lq, s_len) + mask[None]).reshape(H * bt, lq, s_len)

    # ---- single f32 softmax for all heads (EUP exp + approx reciprocal) ----
    m = jnp.max(s, axis=-1, keepdims=True)
    ex = jnp.exp(s - m)
    p = ex * pl.reciprocal(jnp.sum(ex, axis=-1, keepdims=True), approx=True)

    # ---- one batched contraction for P @ V ----
    ctx_hb = jnp.einsum("bqk,bkd->bqd", p.astype(jnp.bfloat16), v_hb,
                        preferred_element_type=jnp.float32)         # (H*bt, lq, hd) f32

    # ---- output projection fused with the head re-pack:
    #      contract each head's hd-slice of Wo and sum over heads (no lane concat) ----
    ctx_h = ctx_hb.reshape(H, bt * lq, hd).astype(jnp.bfloat16)     # leading-dim reshape only
    attn_h = jnp.einsum("hmd,hde->hme", ctx_h, wo_ref[...],
                        preferred_element_type=jnp.float32)         # (H, bt*lq, E)
    attn = jnp.sum(attn_h, axis=0) + bo                             # (bt*lq, E)

    # ---- residual + LayerNorm over the feature dim (f32) ----
    y = xq + attn
    mu = jnp.mean(y, axis=-1, keepdims=True)
    var = jnp.mean(jnp.square(y - mu), axis=-1, keepdims=True)
    yn = (y - mu) * jax.lax.rsqrt(var + LN_EPS)
    o_ref[...] = (yn * ln_w + ln_b).astype(o_ref.dtype)


# ------------------------- VMEM-budget-aware sizing -------------------------

def _vmem_capacity_bytes():
    try:
        return int(pltpu.get_tpu_info().vmem_capacity_bytes)
    except Exception:
        return 64 * 1024 * 1024      # conservative (v7x per-TC) if the query is unavailable


def _per_step_vmem_bytes(bt, B, lq, s, e, fuse_kv, has_mask):
    """Rough per-grid-step VMEM footprint (streamed blocks double-buffered + temporaries)."""
    H = NUM_HEADS
    hd = e // H
    q_blk = bt * lq * e * 4                      # f32
    k_blk = bt * s * e * 2                       # bf16
    v_blk = 0 if fuse_kv else bt * s * e * 2     # bf16
    o_blk = bt * lq * e * 4                      # f32
    streamed = 2 * (q_blk + k_blk + v_blk + o_blk)
    weights = 2 * (e * e * 2 + e * 2 * e * 2 + H * hd * e * 2 + 6 * e * 4)
    mask = B * 8 * s * 4 if has_mask else 0      # size-1 sublane padded to 8, fetched once
    scores = 3 * H * bt * lq * s * 4             # s / exp / p (f32)
    proj = (bt * lq * e + 2 * bt * s * e) * 6    # q/k/v f32 + bf16 copies
    ctx = H * bt * lq * hd * 6
    attn = H * bt * lq * e * 4 + 2 * bt * lq * e * 4
    return streamed + weights + mask + scores + proj + ctx + attn


def _pick_bt(B, lq, s, e, fuse_kv, has_mask, vmem_cap):
    """Largest batch-block that fits the VMEM budget; prefer a grid of length >= 2 so the
    'parallel' batch axis can use both TensorCores on v7x."""
    budget = int(vmem_cap * 0.7)
    divisors = [d for d in range(1, min(B, 64) + 1) if B % d == 0]
    fitting = [d for d in divisors
               if _per_step_vmem_bytes(d, B, lq, s, e, fuse_kv, has_mask) <= budget]
    if not fitting:
        fitting = [1]
    multi = [d for d in fitting if B // d >= 2]
    # TODO(synk): on single-TC chips (v5e/v6e) drop the grid>=2 preference and let bt grow.
    return max(multi) if multi else max(fitting)


# --------------------------------- wrapper ----------------------------------

def cross_attention_pallas(query, key, value, params, key_padding_mask=None):
    """query (B, Lq, E); key/value (B, S, E); optional bool key_padding_mask (B, S),
    True = ignore (PyTorch convention)."""
    B, Lq, E = query.shape
    S = key.shape[1]
    assert E % NUM_HEADS == 0
    assert value.shape == key.shape
    # demo kernel keeps layouts clean by requiring 8-row-aligned sequence lengths
    assert Lq % 8 == 0 and S % 8 == 0

    hd = E // NUM_HEADS
    scale = 1.0 / math.sqrt(hd)
    fuse_kv = key is value
    has_mask = key_padding_mask is not None

    vmem_cap = _vmem_capacity_bytes()
    bt = _pick_bt(B, Lq, S, E, fuse_kv, has_mask, vmem_cap)
    grid = (B // bt,)
    est = _per_step_vmem_bytes(bt, B, Lq, S, E, fuse_kv, has_mask)
    vmem_limit = int(min(vmem_cap * 0.9, max(32 * 1024 * 1024, 2 * est)))

    # ---- host-side parameter prep (weights bf16, 1/sqrt(hd) folded into Wq/bq) ----
    wq_t = (params["wq"].T * scale).astype(jnp.bfloat16)                       # (E, E)
    wkv_t = jnp.concatenate([params["wk"].T, params["wv"].T], axis=1
                            ).astype(jnp.bfloat16)                             # (E, 2E)
    wo_h = params["wo"].T.reshape(NUM_HEADS, hd, E).astype(jnp.bfloat16)       # (H, hd, E)
    vecs = jnp.stack([params["bq"] * scale, params["bk"], params["bv"],
                      params["bo"], params["ln_w"], params["ln_b"]],
                     axis=0).astype(jnp.float32)                               # (6, E)

    # 2-D activation slabs: fold (batch, seq) into the sublane axis; K/V streamed as bf16.
    q2 = query.reshape(B * Lq, E)
    k2 = key.reshape(B * S, E).astype(jnp.bfloat16)

    row_block = lambda rows, dt_rows=None: pl.BlockSpec((bt * rows, E), lambda i: (i, 0))
    const_block = lambda shape: pl.BlockSpec(shape, lambda i: tuple(0 for _ in shape))

    inputs = [q2, k2]
    in_specs = [row_block(Lq), row_block(S)]

    if not fuse_kv:
        v2 = value.reshape(B * S, E).astype(jnp.bfloat16)
        inputs.append(v2)
        in_specs.append(row_block(S))

    if has_mask:
        mask_bias = jnp.where(key_padding_mask[:, None, :], NEG_BIAS, 0.0
                              ).astype(jnp.float32)                            # (B, 1, S)
        inputs.append(mask_bias)
        in_specs.append(const_block((B, 1, S)))        # grid-invariant: fetched once

    inputs += [wq_t, wkv_t, wo_h, vecs]
    in_specs += [const_block((E, E)), const_block((E, 2 * E)),
                 const_block((NUM_HEADS, hd, E)), const_block((6, E))]

    kernel = functools.partial(_cross_attention_kernel, bt=bt, lq=Lq, s_len=S, e=E,
                               fuse_kv=fuse_kv, has_mask=has_mask)

    out2 = pl.pallas_call(
        kernel,
        out_shape=jax.ShapeDtypeStruct((B * Lq, E), query.dtype),
        grid=grid,
        in_specs=in_specs,
        out_specs=row_block(Lq),
        compiler_params=pltpu.CompilerParams(
            dimension_semantics=("parallel",),
            vmem_limit_bytes=vmem_limit),
    )(*inputs)

    return out2.reshape(B, Lq, E)


# --------------------------------- reference --------------------------------

def _reference(query, key, value, params, key_padding_mask=None):
    """Pure-JAX f32 reference mirroring torch.nn.MultiheadAttention + LayerNorm."""
    B, Lq, E = query.shape
    S = key.shape[1]
    hd = E // NUM_HEADS
    q = query @ params["wq"].T + params["bq"]
    k = key @ params["wk"].T + params["bk"]
    v = value @ params["wv"].T + params["bv"]
    qh = q.reshape(B, Lq, NUM_HEADS, hd).transpose(0, 2, 1, 3)
    kh = k.reshape(B, S, NUM_HEADS, hd).transpose(0, 2, 1, 3)
    vh = v.reshape(B, S, NUM_HEADS, hd).transpose(0, 2, 1, 3)
    s = jnp.einsum("bhqd,bhkd->bhqk", qh, kh) / math.sqrt(hd)
    if key_padding_mask is not None:
        s = s + jnp.where(key_padding_mask[:, None, None, :], NEG_BIAS, 0.0)
    p = jax.nn.softmax(s, axis=-1)
    ctx = jnp.einsum("bhqk,bhkd->bhqd", p, vh).transpose(0, 2, 1, 3).reshape(B, Lq, E)
    attn_out = ctx @ params["wo"].T + params["bo"]
    y = query + attn_out
    mean = y.mean(-1, keepdims=True)
    var = ((y - mean) ** 2).mean(-1, keepdims=True)
    return (y - mean) / jnp.sqrt(var + LN_EPS) * params["ln_w"] + params["ln_b"]


def init_params(hidden_size, key):
    ks = jax.random.split(key, 8)
    scale = 1.0 / math.sqrt(hidden_size)
    return {
        "wq": jax.random.uniform(ks[0], (hidden_size, hidden_size), jnp.float32, -scale, scale),
        "wk": jax.random.uniform(ks[1], (hidden_size, hidden_size), jnp.float32, -scale, scale),
        "wv": jax.random.uniform(ks[2], (hidden_size, hidden_size), jnp.float32, -scale, scale),
        "wo": jax.random.uniform(ks[3], (hidden_size, hidden_size), jnp.float32, -scale, scale),
        "bq": jax.random.uniform(ks[4], (hidden_size,), jnp.float32, -scale, scale),
        "bk": jax.random.uniform(ks[5], (hidden_size,), jnp.float32, -scale, scale),
        "bv": jax.random.uniform(ks[6], (hidden_size,), jnp.float32, -scale, scale),
        "bo": jax.random.uniform(ks[7], (hidden_size,), jnp.float32, -scale, scale),
        "ln_w": jnp.ones((hidden_size,), jnp.float32),
        "ln_b": jnp.zeros((hidden_size,), jnp.float32),
    }


if __name__ == "__main__":
    E = 32                      # hidden -> 8 heads x head_dim 4
    root = jax.random.PRNGKey(0)
    k1, k2, k3, k4, k5, k6 = jax.random.split(root, 6)
    params = init_params(E, k1)

    # Case 1: typical cross-attention (key tensor is also the value tensor)
    #         -> fused KV projection path, no value / no mask streamed, grid of 2 blocks.
    B, Lq, S = 2, 8, 8
    query = jax.random.normal(k2, (B, Lq, E), jnp.float32)
    memory = jax.random.normal(k3, (B, S, E), jnp.float32)
    out1 = jax.block_until_ready(cross_attention_pallas(query, memory, memory, params))
    ref1 = _reference(query, memory, memory, params)
    np.testing.assert_allclose(np.asarray(out1), np.asarray(ref1), rtol=2e-2, atol=2e-2)

    # Case 2: distinct key/value tensors + key_padding_mask, batch-blocked (bt=2).
    B2, Lq2, S2 = 4, 8, 16
    query2 = jax.random.normal(k4, (B2, Lq2, E), jnp.float32)
    key2 = jax.random.normal(k5, (B2, S2, E), jnp.float32)
    value2 = jax.random.normal(k6, (B2, S2, E), jnp.float32)
    lengths = jnp.array([16, 12, 9, 16])
    kpm = jnp.arange(S2)[None, :] >= lengths[:, None]        # True = ignore (padding)
    out2 = jax.block_until_ready(
        cross_attention_pallas(query2, key2, value2, params, key_padding_mask=kpm))
    ref2 = _reference(query2, key2, value2, params, key_padding_mask=kpm)
    np.testing.assert_allclose(np.asarray(out2), np.asarray(ref2), rtol=2e-2, atol=2e-2)

    print("KERNEL_OK")
</pallas_src>

<mosaic_0001>
module attributes {stable_mosaic.version = 11 : i64} {
  func.func @_cross_attention_kernel(%arg0: i32, %arg1: memref<8x32xf32, #tpu.memory_space<vmem>>, %arg2: memref<8x32xbf16, #tpu.memory_space<vmem>>, %arg3: memref<32x32xbf16, #tpu.memory_space<vmem>>, %arg4: memref<32x64xbf16, #tpu.memory_space<vmem>>, %arg5: memref<8x4x32xbf16, #tpu.memory_space<vmem>>, %arg6: memref<6x32xf32, #tpu.memory_space<vmem>>, %arg7: memref<8x32xf32, #tpu.memory_space<vmem>>) attributes {dimension_semantics = [#tpu.dimension_semantics<parallel>], iteration_bounds = array<i64: 2>, scalar_prefetch = 0 : i64, scratch_operands = 0 : i64, tpu.core_type = #tpu.core_type<tc>, window_params = [{transform_indices = @transform_0, window_bounds = array<i64: 8, 32>}, {transform_indices = @transform_1, window_bounds = array<i64: 8, 32>}, {pipeline_mode = #tpu.pipeline_mode<synchronous>, transform_indices = @transform_2, window_bounds = array<i64: 32, 32>}, {pipeline_mode = #tpu.pipeline_mode<synchronous>, transform_indices = @transform_3, window_bounds = array<i64: 32, 64>}, {pipeline_mode = #tpu.pipeline_mode<synchronous>, transform_indices = @transform_4, window_bounds = array<i64: 8, 4, 32>}, {pipeline_mode = #tpu.pipeline_mode<synchronous>, transform_indices = @transform_5, window_bounds = array<i64: 6, 32>}, {transform_indices = @transform_6, window_bounds = array<i64: 8, 32>}]} {
    %c0 = arith.constant 0 : index
    %c0_0 = arith.constant 0 : index
    %0 = vector.load %arg1[%c0, %c0_0] : memref<8x32xf32, #tpu.memory_space<vmem>>, vector<8x32xf32>
    %c0_1 = arith.constant 0 : index
    %c0_2 = arith.constant 0 : index
    %1 = vector.load %arg6[%c0_1, %c0_2] : memref<6x32xf32, #tpu.memory_space<vmem>>, vector<1x32xf32>
    %c1 = arith.constant 1 : index
    %c0_3 = arith.constant 0 : index
    %2 = vector.load %arg6[%c1, %c0_3] : memref<6x32xf32, #tpu.memory_space<vmem>>, vector<1x32xf32>
    %c2 = arith.constant 2 : index
    %c0_4 = arith.constant 0 : index
    %3 = vector.load %arg6[%c2, %c0_4] : memref<6x32xf32, #tpu.memory_space<vmem>>, vector<1x32xf32>
    %c3 = arith.constant 3 : index
    %c0_5 = arith.constant 0 : index
    %4 = vector.load %arg6[%c3, %c0_5] : memref<6x32xf32, #tpu.memory_space<vmem>>, vector<1x32xf32>
    %c4 = arith.constant 4 : index
    %c0_6 = arith.constant 0 : index
    %5 = vector.load %arg6[%c4, %c0_6] : memref<6x32xf32, #tpu.memory_space<vmem>>, vector<1x32xf32>
    %c5 = arith.constant 5 : index
    %c0_7 = arith.constant 0 : index
    %6 = vector.load %arg6[%c5, %c0_7] : memref<6x32xf32, #tpu.memory_space<vmem>>, vector<1x32xf32>
    %7 = arith.truncf %0 : vector<8x32xf32> to vector<8x32xbf16>
    %c0_8 = arith.constant 0 : index
    %c0_9 = arith.constant 0 : index
    %8 = vector.load %arg3[%c0_8, %c0_9] : memref<32x32xbf16, #tpu.memory_space<vmem>>, vector<32x32xbf16>
    %cst = arith.constant dense<0.000000e+00> : vector<8x32xf32>
    %9 = tpu.matmul %7, %8, %cst {dimension_numbers = #tpu.dot_dimension_numbers<[1], [0], [0], [1], [0, 0, 1, 1], [], []>} : vector<8x32xbf16>, vector<32x32xbf16>, vector<8x32xf32> -> vector<8x32xf32>
    %10 = vector.broadcast %1 : vector<1x32xf32> to vector<8x32xf32>
    %11 = arith.addf %9, %10 : vector<8x32xf32>
    %c0_10 = arith.constant 0 : index
    %c0_11 = arith.constant 0 : index
    %12 = vector.load %arg2[%c0_10, %c0_11] : memref<8x32xbf16, #tpu.memory_space<vmem>>, vector<8x32xbf16>
    %c0_12 = arith.constant 0 : index
    %c0_13 = arith.constant 0 : index
    %13 = vector.load %arg4[%c0_12, %c0_13] : memref<32x64xbf16, #tpu.memory_space<vmem>>, vector<32x64xbf16>
    %cst_14 = arith.constant dense<0.000000e+00> : vector<8x64xf32>
    %14 = tpu.matmul %12, %13, %cst_14 {dimension_numbers = #tpu.dot_dimension_numbers<[1], [0], [0], [1], [0, 0, 1, 1], [], []>} : vector<8x32xbf16>, vector<32x64xbf16>, vector<8x64xf32> -> vector<8x64xf32>
    %15 = vector.extract_strided_slice %14 {offsets = [0, 0], sizes = [8, 32], strides = [1, 1]} : vector<8x64xf32> to vector<8x32xf32>
    %16 = vector.broadcast %2 : vector<1x32xf32> to vector<8x32xf32>
    %17 = arith.addf %15, %16 : vector<8x32xf32>
    %18 = vector.extract_strided_slice %14 {offsets = [0, 32], sizes = [8, 32], strides = [1, 1]} : vector<8x64xf32> to vector<8x32xf32>
    %19 = vector.broadcast %3 : vector<1x32xf32> to vector<8x32xf32>
    %20 = arith.addf %18, %19 : vector<8x32xf32>
    %21 = arith.truncf %11 : vector<8x32xf32> to vector<8x32xbf16>
    %22 = arith.truncf %17 : vector<8x32xf32> to vector<8x32xbf16>
    %23 = arith.truncf %20 : vector<8x32xf32> to vector<8x32xbf16>
    %24 = vector.extract_strided_slice %21 {offsets = [0, 0], sizes = [8, 4], strides = [1, 1]} : vector<8x32xbf16> to vector<8x4xbf16>
    %25 = vector.shape_cast %24 : vector<8x4xbf16> to vector<1x8x4xbf16>
    %26 = vector.extract_strided_slice %21 {offsets = [0, 4], sizes = [8, 4], strides = [1, 1]} : vector<8x32xbf16> to vector<8x4xbf16>
    %27 = vector.shape_cast %26 : vector<8x4xbf16> to vector<1x8x4xbf16>
    %28 = vector.extract_strided_slice %21 {offsets = [0, 8], sizes = [8, 4], strides = [1, 1]} : vector<8x32xbf16> to vector<8x4xbf16>
    %29 = vector.shape_cast %28 : vector<8x4xbf16> to vector<1x8x4xbf16>
    %30 = vector.extract_strided_slice %21 {offsets = [0, 12], sizes = [8, 4], strides = [1, 1]} : vector<8x32xbf16> to vector<8x4xbf16>
    %31 = vector.shape_cast %30 : vector<8x4xbf16> to vector<1x8x4xbf16>
    %32 = vector.extract_strided_slice %21 {offsets = [0, 16], sizes = [8, 4], strides = [1, 1]} : vector<8x32xbf16> to vector<8x4xbf16>
    %33 = vector.shape_cast %32 : vector<8x4xbf16> to vector<1x8x4xbf16>
    %34 = vector.extract_strided_slice %21 {offsets = [0, 20], sizes = [8, 4], strides = [1, 1]} : vector<8x32xbf16> to vector<8x4xbf16>
    %35 = vector.shape_cast %34 : vector<8x4xbf16> to vector<1x8x4xbf16>
    %36 = vector.extract_strided_slice %21 {offsets = [0, 24], sizes = [8, 4], strides = [1, 1]} : vector<8x32xbf16> to vector<8x4xbf16>
    %37 = vector.shape_cast %36 : vector<8x4xbf16> to vector<1x8x4xbf16>
    %38 = vector.extract_strided_slice %21 {offsets = [0, 28], sizes = [8, 4], strides = [1, 1]} : vector<8x32xbf16> to vector<8x4xbf16>
    %39 = vector.shape_cast %38 : vector<8x4xbf16> to vector<1x8x4xbf16>
    %40 = tpu.concatenate %25, %27, %29, %31, %33, %35, %37, %39 in 0 : vector<1x8x4xbf16>, vector<1x8x4xbf16>, vector<1x8x4xbf16>, vector<1x8x4xbf16>, vector<1x8x4xbf16>, vector<1x8x4xbf16>, vector<1x8x4xbf16>, vector<1x8x4xbf16> -> vector<8x8x4xbf16>
    %41 = vector.extract_strided_slice %22 {offsets = [0, 0], sizes = [8, 4], strides = [1, 1]} : vector<8x32xbf16> to vector<8x4xbf16>
    %42 = vector.shape_cast %41 : vector<8x4xbf16> to vector<1x8x4xbf16>
    %43 = vector.extract_strided_slice %22 {offsets = [0, 4], sizes = [8, 4], strides = [1, 1]} : vector<8x32xbf16> to vector<8x4xbf16>
    %44 = vector.shape_cast %43 : vector<8x4xbf16> to vector<1x8x4xbf16>
    %45 = vector.extract_strided_slice %22 {offsets = [0, 8], sizes = [8, 4], strides = [1, 1]} : vector<8x32xbf16> to vector<8x4xbf16>
    %46 = vector.shape_cast %45 : vector<8x4xbf16> to vector<1x8x4xbf16>
    %47 = vector.extract_strided_slice %22 {offsets = [0, 12], sizes = [8, 4], strides = [1, 1]} : vector<8x32xbf16> to vector<8x4xbf16>
    %48 = vector.shape_cast %47 : vector<8x4xbf16> to vector<1x8x4xbf16>
    %49 = vector.extract_strided_slice %22 {offsets = [0, 16], sizes = [8, 4], strides = [1, 1]} : vector<8x32xbf16> to vector<8x4xbf16>
    %50 = vector.shape_cast %49 : vector<8x4xbf16> to vector<1x8x4xbf16>
    %51 = vector.extract_strided_slice %22 {offsets = [0, 20], sizes = [8, 4], strides = [1, 1]} : vector<8x32xbf16> to vector<8x4xbf16>
    %52 = vector.shape_cast %51 : vector<8x4xbf16> to vector<1x8x4xbf16>
    %53 = vector.extract_strided_slice %22 {offsets = [0, 24], sizes = [8, 4], strides = [1, 1]} : vector<8x32xbf16> to vector<8x4xbf16>
    %54 = vector.shape_cast %53 : vector<8x4xbf16> to vector<1x8x4xbf16>
    %55 = vector.extract_strided_slice %22 {offsets = [0, 28], sizes = [8, 4], strides = [1, 1]} : vector<8x32xbf16> to vector<8x4xbf16>
    %56 = vector.shape_cast %55 : vector<8x4xbf16> to vector<1x8x4xbf16>
    %57 = tpu.concatenate %42, %44, %46, %48, %50, %52, %54, %56 in 0 : vector<1x8x4xbf16>, vector<1x8x4xbf16>, vector<1x8x4xbf16>, vector<1x8x4xbf16>, vector<1x8x4xbf16>, vector<1x8x4xbf16>, vector<1x8x4xbf16>, vector<1x8x4xbf16> -> vector<8x8x4xbf16>
    %58 = vector.extract_strided_slice %23 {offsets = [0, 0], sizes = [8, 4], strides = [1, 1]} : vector<8x32xbf16> to vector<8x4xbf16>
    %59 = vector.shape_cast %58 : vector<8x4xbf16> to vector<1x8x4xbf16>
    %60 = vector.extract_strided_slice %23 {offsets = [0, 4], sizes = [8, 4], strides = [1, 1]} : vector<8x32xbf16> to vector<8x4xbf16>
    %61 = vector.shape_cast %60 : vector<8x4xbf16> to vector<1x8x4xbf16>
    %62 = vector.extract_strided_slice %23 {offsets = [0, 8], sizes = [8, 4], strides = [1, 1]} : vector<8x32xbf16> to vector<8x4xbf16>
    %63 = vector.shape_cast %62 : vector<8x4xbf16> to vector<1x8x4xbf16>
    %64 = vector.extract_strided_slice %23 {offsets = [0, 12], sizes = [8, 4], strides = [1, 1]} : vector<8x32xbf16> to vector<8x4xbf16>
    %65 = vector.shape_cast %64 : vector<8x4xbf16> to vector<1x8x4xbf16>
    %66 = vector.extract_strided_slice %23 {offsets = [0, 16], sizes = [8, 4], strides = [1, 1]} : vector<8x32xbf16> to vector<8x4xbf16>
    %67 = vector.shape_cast %66 : vector<8x4xbf16> to vector<1x8x4xbf16>
    %68 = vector.extract_strided_slice %23 {offsets = [0, 20], sizes = [8, 4], strides = [1, 1]} : vector<8x32xbf16> to vector<8x4xbf16>
    %69 = vector.shape_cast %68 : vector<8x4xbf16> to vector<1x8x4xbf16>
    %70 = vector.extract_strided_slice %23 {offsets = [0, 24], sizes = [8, 4], strides = [1, 1]} : vector<8x32xbf16> to vector<8x4xbf16>
    %71 = vector.shape_cast %70 : vector<8x4xbf16> to vector<1x8x4xbf16>
    %72 = vector.extract_strided_slice %23 {offsets = [0, 28], sizes = [8, 4], strides = [1, 1]} : vector<8x32xbf16> to vector<8x4xbf16>
    %73 = vector.shape_cast %72 : vector<8x4xbf16> to vector<1x8x4xbf16>
    %74 = tpu.concatenate %59, %61, %63, %65, %67, %69, %71, %73 in 0 : vector<1x8x4xbf16>, vector<1x8x4xbf16>, vector<1x8x4xbf16>, vector<1x8x4xbf16>, vector<1x8x4xbf16>, vector<1x8x4xbf16>, vector<1x8x4xbf16>, vector<1x8x4xbf16> -> vector<8x8x4xbf16>
    "tpu.trace_start"() <{level = 10 : i32, message = "bqd,bkd->bqk"}> : () -> ()
    %cst_15 = arith.constant dense<0.000000e+00> : vector<8x8x8xf32>
    %75 = tpu.matmul %40, %57, %cst_15 {dimension_numbers = #tpu.dot_dimension_numbers<[2], [2], [1], [1], [0, 0, 0, 1, 1, 1], [0], [0]>} : vector<8x8x4xbf16>, vector<8x8x4xbf16>, vector<8x8x8xf32> -> vector<8x8x8xf32>
    "tpu.trace_stop"() : () -> ()
    %cst_16 = arith.constant dense<0xFF800000> : vector<8x8xf32>
    %76 = vector.multi_reduction <maximumf>, %75, %cst_16 [2] : vector<8x8x8xf32> to vector<8x8xf32>
    %77 = vector.shape_cast %76 : vector<8x8xf32> to vector<8x8x1xf32>
    %78 = vector.broadcast %77 : vector<8x8x1xf32> to vector<8x8x8xf32>
    %79 = arith.subf %75, %78 : vector<8x8x8xf32>
    %80 = math.exp %79 : vector<8x8x8xf32>
    %cst_17 = arith.constant dense<0.000000e+00> : vector<8x8xf32>
    %81 = vector.multi_reduction <add>, %80, %cst_17 [2] : vector<8x8x8xf32> to vector<8x8xf32>
    %82 = vector.shape_cast %81 : vector<8x8xf32> to vector<8x8x1xf32>
    %83 = tpu.reciprocal %82 {approx = true} : vector<8x8x1xf32> -> vector<8x8x1xf32>
    %84 = vector.broadcast %83 : vector<8x8x1xf32> to vector<8x8x8xf32>
    %85 = arith.mulf %80, %84 : vector<8x8x8xf32>
    %86 = arith.truncf %85 : vector<8x8x8xf32> to vector<8x8x8xbf16>
    "tpu.trace_start"() <{level = 10 : i32, message = "bqk,bkd->bqd"}> : () -> ()
    %cst_18 = arith.constant dense<0.000000e+00> : vector<8x8x4xf32>
    %87 = tpu.matmul %86, %74, %cst_18 {dimension_numbers = #tpu.dot_dimension_numbers<[2], [1], [1], [2], [0, 0, 0, 1, 1, 2], [0], [0]>} : vector<8x8x8xbf16>, vector<8x8x4xbf16>, vector<8x8x4xf32> -> vector<8x8x4xf32>
    "tpu.trace_stop"() : () -> ()
    %88 = arith.truncf %87 : vector<8x8x4xf32> to vector<8x8x4xbf16>
    %c0_19 = arith.constant 0 : index
    %c0_20 = arith.constant 0 : index
    %c0_21 = arith.constant 0 : index
    %89 = vector.load %arg5[%c0_19, %c0_20, %c0_21] : memref<8x4x32xbf16, #tpu.memory_space<vmem>>, vector<8x4x32xbf16>
    "tpu.trace_start"() <{level = 10 : i32, message = "hmd,hde->hme"}> : () -> ()
    %cst_22 = arith.constant dense<0.000000e+00> : vector<8x8x32xf32>
    %90 = tpu.matmul %88, %89, %cst_22 {dimension_numbers = #tpu.dot_dimension_numbers<[2], [1], [1], [2], [0, 0, 0, 1, 1, 2], [0], [0]>} : vector<8x8x4xbf16>, vector<8x4x32xbf16>, vector<8x8x32xf32> -> vector<8x8x32xf32>
    "tpu.trace_stop"() : () -> ()
    %cst_23 = arith.constant dense<0.000000e+00> : vector<8x32xf32>
    %91 = vector.multi_reduction <add>, %90, %cst_23 [0] : vector<8x8x32xf32> to vector<8x32xf32>
    %92 = vector.broadcast %4 : vector<1x32xf32> to vector<8x32xf32>
    %93 = arith.addf %91, %92 : vector<8x32xf32>
    %94 = arith.addf %0, %93 : vector<8x32xf32>
    %cst_24 = arith.constant dense<0.000000e+00> : vector<8xf32>
    %95 = vector.multi_reduction <add>, %94, %cst_24 [1] : vector<8x32xf32> to vector<8xf32>
    %96 = vector.shape_cast %95 : vector<8xf32> to vector<8x1xf32>
    %cst_25 = arith.constant 3.200000e+01 : f32
    %97 = vector.broadcast %cst_25 : f32 to vector<8x1xf32>
    %98 = arith.divf %96, %97 : vector<8x1xf32>
    %99 = vector.broadcast %98 : vector<8x1xf32> to vector<8x32xf32>
    %100 = arith.subf %94, %99 : vector<8x32xf32>
    %101 = arith.mulf %100, %100 : vector<8x32xf32>
    %cst_26 = arith.constant dense<0.000000e+00> : vector<8xf32>
    %102 = vector.multi_reduction <add>, %101, %cst_26 [1] : vector<8x32xf32> to vector<8xf32>
    %103 = vector.shape_cast %102 : vector<8xf32> to vector<8x1xf32>
    %cst_27 = arith.constant 3.200000e+01 : f32
    %104 = vector.broadcast %cst_27 : f32 to vector<8x1xf32>
    %105 = arith.divf %103, %104 : vector<8x1xf32>
    %106 = vector.broadcast %98 : vector<8x1xf32> to vector<8x32xf32>
    %107 = arith.subf %94, %106 : vector<8x32xf32>
    %cst_28 = arith.constant 9.99999974E-6 : f32
    %108 = vector.broadcast %cst_28 : f32 to vector<8x1xf32>
    %109 = arith.addf %105, %108 : vector<8x1xf32>
    %110 = math.rsqrt %109 : vector<8x1xf32>
    %111 = vector.broadcast %110 : vector<8x1xf32> to vector<8x32xf32>
    %112 = arith.mulf %107, %111 : vector<8x32xf32>
    %113 = vector.broadcast %5 : vector<1x32xf32> to vector<8x32xf32>
    %114 = arith.mulf %112, %113 : vector<8x32xf32>
    %115 = vector.broadcast %6 : vector<1x32xf32> to vector<8x32xf32>
    %116 = arith.addf %114, %115 : vector<8x32xf32>
    %c0_29 = arith.constant 0 : index
    %c0_30 = arith.constant 0 : index
    %117 = vector.load %arg7[%c0_29, %c0_30] : memref<8x32xf32, #tpu.memory_space<vmem>>, vector<8x32xf32>
    tpu.vector_store %arg7[%c0_29, %c0_30], %116 {strides = array<i32>} : memref<8x32xf32, #tpu.memory_space<vmem>>, vector<8x32xf32>,
    return
  }
  func.func @transform_0(%arg0: i32) -> (i32, i32) {
    %c0_i32 = arith.constant 0 : i32
    %c0_i32_0 = arith.constant 0 : i32
    return %arg0, %c0_i32 : i32, i32
  }
  func.func @transform_1(%arg0: i32) -> (i32, i32) {
    %c0_i32 = arith.constant 0 : i32
    %c0_i32_0 = arith.constant 0 : i32
    return %arg0, %c0_i32 : i32, i32
  }
  func.func @transform_2(%arg0: i32) -> (i32, i32) {
    %c0_i32 = arith.constant 0 : i32
    %c0_i32_0 = arith.constant 0 : i32
    %c0_i32_1 = arith.constant 0 : i32
    return %c0_i32, %c0_i32_0 : i32, i32
  }
  func.func @transform_3(%arg0: i32) -> (i32, i32) {
    %c0_i32 = arith.constant 0 : i32
    %c0_i32_0 = arith.constant 0 : i32
    %c0_i32_1 = arith.constant 0 : i32
    return %c0_i32, %c0_i32_0 : i32, i32
  }
  func.func @transform_4(%arg0: i32) -> (i32, i32, i32) {
    %c0_i32 = arith.constant 0 : i32
    %c0_i32_0 = arith.constant 0 : i32
    %c0_i32_1 = arith.constant 0 : i32
    %c0_i32_2 = arith.constant 0 : i32
    return %c0_i32, %c0_i32_0, %c0_i32_1 : i32, i32, i32
  }
  func.func @transform_5(%arg0: i32) -> (i32, i32) {
    %c0_i32 = arith.constant 0 : i32
    %c0_i32_0 = arith.constant 0 : i32
    %c0_i32_1 = arith.constant 0 : i32
    return %c0_i32, %c0_i32_0 : i32, i32
  }
  func.func @transform_6(%arg0: i32) -> (i32, i32) {
    %c0_i32 = arith.constant 0 : i32
    %c0_i32_0 = arith.constant 0 : i32
    return %arg0, %c0_i32 : i32, i32
  }
}

</mosaic_0001>

<bundles_post_ra>
// kernel: tpu_custom_call.1
= control target key start
LH: loop header
LB: loop body
LE: loop exit
PB: predicated region body
PF: predicated region fallthrough
CT: control target
= control target key end

     0   :  { %s2225_s0 = inlined_call_operand.hbm [shape: f32[16,32], index: 0, kind: input, shape index: {}]   ;;  %s2226_s1 = inlined_call_operand.hbm [shape: bf16[16,32], index: 1, kind: input, shape index: {}]   ;;  %s2227_s2 = inlined_call_operand.hbm [shape: bf16[32,32], index: 2, kind: input, shape index: {}]   ;;  %s2228_s3 = inlined_call_operand.hbm [shape: bf16[32,64], index: 3, kind: input, shape index: {}]   ;;  %s2229_s4 = inlined_call_operand.hbm [shape: bf16[8,4,32], index: 4, kind: input, shape index: {}]   ;;  %s2230_s5 = inlined_call_operand.hbm [shape: f32[6,32], index: 5, kind: input, shape index: {}]   ;;  %s2231_s6 = inlined_call_operand.hbm [shape: f32[16,32], index: 6, kind: output, shape index: {}]  }
   0x1   :  { %2232 = sst [smem:[#allocation21_spill]] %s2227_s2 }
   0x2   :  { %2233 = sst [smem:[#allocation22_spill]] %s2228_s3 }
   0x3   :  { %2234 = sst [smem:[#allocation23_spill]] %s2229_s4 }
   0x4   :  { %2235 = sst [smem:[#allocation24_spill]] %s2230_s5 }
   0x5   :  { %11 = vsyncpa [#allocation3], 0 }
   0x6   :  { %13 = vsyncpa [#allocation3 + $0x1], 0 }
   0x7   :  { %14 = vsyncpa [#allocation6], 0 }
   0x8   :  { %16 = vsyncpa [#allocation6 + $0x1], 0 }
   0x9   :  { %17 = vsyncpa [#allocation9], 0 }
   0xa   :  { %18 = vsyncpa [#allocation12], 0 }
   0xb   :  { %19 = vsyncpa [#allocation4], 0 }
   0xc   :  { %21 = vsyncpa [#allocation4 + $0x1], 0  ;;  %s1841_s21 = smov 0   ;;  %s1843_s22 = smov 0  }
   0xd   :  { %s1845_s23 = smov 0   ;;  %s1847_s24 = smov 0  }
   0xe LB: > { %s2236_s2 = sld [smem:[#allocation21_spill]]  ;;  %s1865_s28 = sadd.s32 4294967295, %s1786_s24   ;;  %s1786_s24 = sphi %s1847_s24, %s2253_s24   ;;  %s1782_s23 = sphi %s1845_s23, %s2252_s23   ;;  %s1778_s22 = sphi %s1843_s22, %s2251_s22   ;;  %s1774_s21 = sphi %s1841_s21, %s2250_s21  }
   0xf   : > { %p1308_p0 = scmp.ge.s32.totalorder %s1786_s24, 1  ;;  %p48_p1 = scmp.eq.s32.totalorder %s1865_s28, 0 }
  0x10   : > { %p194_p2 = scmp.lt.s32.totalorder %s1786_s24, 3  ;;  %s1788_s30 = smov [#allocation7]  }
  0x11   : > { %s207_s7 = sshll.u32 %s1788_s30, 4  ;;  %s2238_s3 = sld [smem:[#allocation22_spill]]  ;;  %s208_s7 = int_to_ptr.vmem [resolvable:$true] %s207_s7 }
  0x12   : > { %p1870_p3 = pnand %p1308_p0, %p194_p2  ;;  %s2240_s4 = sld [smem:[#allocation23_spill]] }
  0x13   : > { %s1789_s15 = smov [#allocation8]   ;;  %s1790_s17 = smov 64  }
  0x14   : > { %s205_s27 = sshll.u32 %s2236_s2, 4  ;;  %p1398_p4 = pneg %p1870_p3  ;;  %s206_s27 = int_to_ptr.hbm [resolvable:$true] %s205_s27 }
  0x15   : > { %s221_s16 = sshll.u32 %s1789_s15, 4  ;;  %s1791_s18 = smov 4   ;;  %s222_s16 = int_to_ptr.vmem [resolvable:$true] %s221_s16 }
  0x16   : > { %p1882_p6 = pnand %p1398_p4, %p48_p1  ;;  %s1792_s19 = smov [#allocation10]  }
  0x17   : > { %s219_s10 = sshll.u32 %s2238_s3, 4  ;;  %s235_s20 = sshll.u32 %s1792_s19, 4  ;;  %s220_s10 = int_to_ptr.hbm [resolvable:$true] %s219_s10  ;;  %s236_s20 = int_to_ptr.vmem [resolvable:$true] %s235_s20 }
  0x18   : > { %s233_s14 = sshll.u32 %s2240_s4, 4  ;;  %s2241_s5 = sld [smem:[#allocation24_spill]]  ;;  %s234_s14 = int_to_ptr.hbm [resolvable:$true] %s233_s14 }
  0x19   : > { %1401 = dma.hbm_to_vmem [thread:$0]  (!%p1882_p6), %s206_s27, 256, %s208_s7, [#allocation6], %s1790_s17, %s1790_s17, %s1791_s18  }
  0x1a   : > { %1404 = dma.hbm_to_vmem [thread:$0]  (!%p1882_p6), %s220_s10, 256, %s222_s16, [#allocation9], %s1790_s17, %s1790_s17, %s1791_s18  }
  0x1b   : > { %s1793_s27 = smov 32   ;;  %s1794_s7 = smov 2  }
  0x1c   : > { %1407 = dma.hbm_to_vmem [thread:$0]  (!%p1882_p6), %s234_s14, 256, %s236_s20, [#allocation9], %s1793_s27, %s1793_s27, %s1794_s7  }
  0x1d   : > { %s1795_s8 = smov [#allocation11]   ;;  %s1307_s10 = sadd.s32 4294967294, %s1786_s24  }
  0x1e   : > { %s248_s30 = sshll.u32 %s2241_s5, 4  ;;  %s250_s9 = sshll.u32 %s1795_s8, 4  ;;  %s249_s30 = int_to_ptr.hbm [resolvable:$true] %s248_s30  ;;  %s251_s9 = int_to_ptr.vmem [resolvable:$true] %s250_s9 }
  0x1f   : > { %1410 = dma.hbm_to_vmem [thread:$0]  (!%p1882_p6), %s249_s30, 128, %s251_s9, [#allocation12]  }
  0x20   : > { %s1902_s12 = sadd.s32 1, %s1786_s24   ;;  %s34_s15 = sadd.s32 1, %s1782_s23 }
  0x21   : > { %s31_s13 = ssub.s32 %s1786_s24, %s1902_s12  ;;  %p41_p8 = scmp.ne.s32.totalorder %s1782_s23, %s1778_s22 }
  0x22   : > { %p32_p7 = scmp.eq.s32.totalorder %s31_s13, 0  ;;  %p42_p9 = scmp.eq.s32.totalorder %s1786_s24, 0 }
  0x23   : > { %p47_p10 = scmp.ne.s32.totalorder %s1778_s22, %s1774_s21  ;;  %p181_p13 = scmp.eq.s32.totalorder %s1865_s28, 1 }
  0x24   : > { %s1913_s14 = scalar_select %p32_p7, %s1782_s23, %s34_s15  }
  0x25   : > { %p1915_p11 = por %p42_p9, %p41_p8  ;;  %p1921_p12 = por %p48_p1, %p47_p10 }
  0x26   : > { %2242 = sst [smem:[#allocation20_spill]] %s1913_s14  ;;  %p187_p0 = scmp.eq.s32.totalorder %s1307_s10, 1 }
  0x27   : > { %p1426_p2 = scmp.lt.s32.totalorder %s1786_s24, 2  ;;  %s1928_s17 = sand.u32 1, %s1782_s23  }
  0x28   : > { %p1930_p4 = por %p181_p13, %p41_p8  ;;  %p1934_p6 = por %p187_p0, %p47_p10 }
  0x29   : > { %s1314_s20 = sshll.u32 %s1928_s17, 3  ;;  %s1315_s25 = sshll.u32 %s1786_s24, 3 }
  0x2a   : > { %s269_s27 = scalar_lea.hbm %s2225_s0, %s1315_s25  ;;  %s265_s7 = scalar_lea.vmem [#allocation2], %s1314_s20 }
  0x2b   : > { %s273_s8 = sshll.u32 %s265_s7, 4  ;;  %s271_s9 = sshll.u32 %s269_s27, 4  ;;  %s274_s8 = int_to_ptr.vmem [resolvable:$true] %s273_s8  ;;  %s272_s9 = int_to_ptr.hbm [resolvable:$true] %s271_s9 }
  0x2c   : > { %p1945_p7 = pnand %p1426_p2, %p1915_p11  ;;  %s280_s13 = sand.u32 1, %s1786_s24  }
  0x2d   : > { %s1316_s15 = sshll.u32 %s1928_s17, 2  ;;  %s262_s2 = scalar_lea.sflag [#allocation3], %s1928_s17 }
  0x2e   : > { %s1644_s3 = sshra.s32 %s272_s9, 4  ;;  %p1648_p9 = pneg %p1945_p7  ;;  %s1645_s3 = int_to_ptr.hbm [resolvable:$true] %s1644_s3 }
  0x2f   : > { %s1646_s4 = scalar_lea.hbm %s1645_s3, 8  ;;  %s1651_s25 = scalar_lea.hbm %s2225_s0, 16 }
  0x30   : > { %p1647_p8 = scmp.ne.s32.totalorder %s1645_s3, %s1646_s4  ;;  %p1652_p11 = scmp.lt.s32.totalorder %s1645_s3, %s2225_s0 }
  0x31   : > { %p1653_p0 = scmp.lt.s32.totalorder %s1651_s25, %s1646_s4 }
  0x32   : > { %p1649_p10 = pnand %p1648_p9, %p1647_p8 }
  0x33   : > { %p1654_p2 = por %p1653_p0, %p1652_p11 }
  0x34   : > { %p1650_p13 = pneg %p1649_p10 }
  0x36   : > { %p1655_p5 = pnand %p1654_p2, %p1650_p13 }
  0x38   : > { %1658 = shalt.err (!%p1655_p5)
}
  0x39   : > { %1414 = dma.hbm_to_vmem [thread:$0]  (!%p1945_p7), %s272_s9, 128, %s274_s8, %s262_s2  }
  0x3a   : > { %s1317_s17 = sshll.u32 %s1786_s24, 2  ;;  %s284_s16 = scalar_lea.vmem [#allocation5], %s1316_s15 }
  0x3b   : > { %s288_s5 = scalar_lea.hbm %s2226_s1, %s1317_s17  ;;  %s292_s20 = sshll.u32 %s284_s16, 4  ;;  %s293_s20 = int_to_ptr.vmem [resolvable:$true] %s292_s20 }
  0x3c   : > { %s290_s14 = sshll.u32 %s288_s5, 4  ;;  %s281_s3 = scalar_lea.sflag [#allocation6], %s280_s13  ;;  %s291_s14 = int_to_ptr.hbm [resolvable:$true] %s290_s14 }
  0x3d   : > { %s1674_s4 = sshra.s32 %s291_s14, 4  ;;  %s1681_s9 = scalar_lea.hbm %s2226_s1, 8  ;;  %s1675_s4 = int_to_ptr.hbm [resolvable:$true] %s1674_s4 }
  0x3e   : > { %s1676_s25 = scalar_lea.hbm %s1675_s4, 4  ;;  %p1682_p13 = scmp.lt.s32.totalorder %s1675_s4, %s2226_s1 }
  0x3f   : > { %p1677_p5 = scmp.ne.s32.totalorder %s1675_s4, %s1676_s25  ;;  %p1683_p11 = scmp.lt.s32.totalorder %s1681_s9, %s1676_s25 }
  0x41   : > { %p1679_p8 = pnand %p1677_p5, %p1648_p9  ;;  %p1684_p0 = por %p1683_p11, %p1682_p13 }
  0x43   : > { %p1680_p10 = pneg %p1679_p8 }
  0x45   : > { %p1685_p2 = pnand %p1684_p0, %p1680_p10 }
  0x47   : > { %1688 = shalt.err (!%p1685_p2)
}
  0x48   : > { %1417 = dma.hbm_to_vmem [thread:$0]  (!%p1945_p7), %s291_s14, 64, %s293_s20, %s281_s3  }
  0x49   : > { %301 = sbr.rel (%p1870_p3) target bundleno = 1397 (0x575), region = 44  ;;  %s1983_s5 = sand.u32 (!%p1870_p3), 1, %s1778_s22  }
  0x4a   : > { %s1319_s13 = sshll.u32 (!%p1870_p3), %s1983_s5, 3  ;;  %s304_s15 = scalar_lea.sflag (!%p1870_p3), [#allocation3], %s1983_s5 }
  0x4b   : > { %s307_s17 = scalar_lea.vmem (!%p1870_p3), [#allocation2], %s1319_s13 }
  0x4e   : > { %1749 = dma.done.wait (%p1921_p12), %s304_s15, 128  }
  0x4f   : > { %1751 = vsyncadd (%p1921_p12), %s304_s15, 4294967168  ;;  %s313_s29 = sand.u32 1, %s1865_s28   ;;  %s1320_s14 = sshll.u32 %s1983_s5, 2 }
  0x50   : > { %s314_s10 = scalar_lea.sflag [#allocation6], %s313_s29  ;;  %s317_s27 = scalar_lea.vmem [#allocation5], %s1320_s14 }
  0x51   : > { %1753 = dma.done.wait (%p1921_p12), %s314_s10, 64  }
  0x52   : > { %1755 = vsyncadd (%p1921_p12), %s314_s10, 4294967232 }
  0x53   : > { %1757 = dma.done.wait (%p48_p1), [#allocation6], 256  }
  0x54   : > { %1759 = vsyncadd (%p48_p1), [#allocation6], 4294967040 }
  0x55   : > { %1761 = dma.done.wait (%p48_p1), [#allocation9], 512  }
  0x56   : > { %1763 = vsyncadd (%p48_p1), [#allocation9], 4294966784 }
  0x57   : > { %1765 = dma.done.wait (%p48_p1), [#allocation12], 128  }
  0x58   : > { %1767 = vsyncadd (%p48_p1), [#allocation12], 4294967168  ;;  %v1373_v0 = vld [vmem:[#allocation7 + $0x8] sm:$0xff]  ;;  %v1375_v1 = vld [vmem:[#allocation8 + $0x8] sm:$0xff]  ;;  %vm398_vm0 = vcmask 261120   ;;  %vm504_vm1 = vcmask 31744  }
  0x59   : > { %v1372_v2 = vld [vmem:[#allocation7] sm:$0xff]  ;;  %v1374_v3 = vld [vmem:[#allocation8] sm:$0xff]  ;;  %408 = vmatpush.bf16.msra.mxu0 %v1373_v0  ;;  %441 = vmatpush.bf16.msra.mxu1 %v1375_v1  ;;  %v415_v6 = vld [vmem:[%s317_s27] sm:$0xf]  ;;  %s1796_s11 = smov 120   ;;  %s1797_s7 = smov 112  }
  0x5a   : > { %v2011_v4 = vld [vmem:[%s307_s17] sm:$0xff]  ;;  %s1798_s16 = smov 124   ;;  %s1799_s20 = smov 108   ;;  %vm657_vm2 = vcmask 64512   ;;  %vm761_vm3 = vcmask 1043456   ;;  %vm958_vm4 = vcmask 1041408  }
  0x5b   : > { %v380_v5 = vpack.c.bf16 %v2011_v4, %v2011_v4  ;;  %v1483_v7 = vld [vmem:[#allocation11 + $0x1] ss:$0 sm:$0xff]  ;;  %v1482_v10 = vld [vmem:[#allocation11] ss:$0 sm:$0xff]  ;;  %s1800_s3 = smov 116   ;;  %s1801_s4 = smov 104  }
  0x5c   : > { %s1802_s25 = smov 100   ;;  %v1484_v18 = vld [vmem:[#allocation11 + $0x2] ss:$0 sm:$0xff]  ;;  %s1803_s2 = smov 32  }
  0x5d   : > { %409 = vmatpush.bf16.msra.mxu0 %v1372_v2  ;;  %442 = vmatpush.bf16.msra.mxu1 %v1374_v3  ;;  %s1804_s8 = smov 96   ;;  %s1369_s9 = sshll.u32 %s1865_s28, 3 }
  0x5e   : > { %s1171_s15 = scalar_lea.hbm %s2231_s6, %s1369_s9  ;;  %s371_s17 = scalar_lea.vmem [#allocation13], %s1319_s13 }
  0x5f   : > { %s1173_s29 = sshll.u32 %s371_s17, 4  ;;  %s1175_s14 = sshll.u32 %s1171_s15, 4  ;;  %s1174_s29 = int_to_ptr.vmem [resolvable:$true] %s1173_s29  ;;  %s1176_s14 = int_to_ptr.hbm [resolvable:$true] %s1175_s14 }
  0x60   : > { %1334 = vmatmul.msk.bf16.vlgmr.msra.gmra.mxu0 %vm398_vm0, %v380_v5  ;;  %1343 = vmatmul.msk.bf16.vlgmr.msra.gmra.mxu1 %vm398_vm0, %v415_v6  ;;  %s1161_s28 = scalar_lea.sflag [#allocation4], %s1983_s5  ;;  %s1718_s10 = sshra.s32 %s1176_s14, 4  ;;  %s1719_s10 = int_to_ptr.hbm [resolvable:$true] %s1718_s10 }
  0x61   : > { %s1720_s27 = scalar_lea.hbm %s1719_s10, 8  ;;  %s1724_s13 = scalar_lea.hbm %s2231_s6, 16 }
  0x62   : > { %p1721_p1 = scmp.ne.s32.totalorder %s1719_s10, %s1720_s27  ;;  %p1725_p7 = scmp.lt.s32.totalorder %s1719_s10, %s2231_s6 }
  0x63   : > { %p1726_p9 = scmp.lt.s32.totalorder %s1724_s13, %s1720_s27 }
  0x64   : > { %p1722_p3 = pnand %p1721_p1, %p1930_p4 }
  0x65   : > { %p1727_p5 = por %p1726_p9, %p1725_p7 }
  0x66   : > { %p1723_p12 = pneg %p1722_p3 }
  0x68   : > { %p1728_p8 = pnand %p1727_p5, %p1723_p12 }
  0xdd   : > { %v411_v8 = vpop.f32.mrf.mxu0  ;;  %v444_v9 = vpop.f32.mrf.mxu1 }
  0xde   : > { %v449_v11 = vadd.f32 %v1483_v7, %v444_v9  ;;  %v412_v13 = vadd.f32 %v1482_v10, %v411_v8 }
  0xe0   : > { %v457_v12 = vpack.c.bf16 %v449_v11, %v449_v11  ;;  %v456_v17 = vpack.c.bf16 %v412_v13, %v412_v13 }
  0xe2   : > { %477 = vrot.lane.b32.xlu2 %v457_v12, %s1796_s11  ;;  %481 = vrot.lane.b32.xlu1 %v457_v12, %s1797_s7  ;;  %v509_v14 = vsel %vm504_vm1, %v457_v12, 0 }
  0xe3   : > { %475 = vrot.lane.b32.xlu0 %v457_v12, %s1798_s16  ;;  %518 = vmatpush.bf16.xpose.msra.mxu2 %v509_v14 }
  0xe5   : > { %v413_v15 = vpop.f32.mrf.mxu0  ;;  %v446_v16 = vpop.f32.mrf.mxu1 }
  0xea   : > { %483 = vrot.lane.b32.xlu1 %v457_v12, %s1799_s20  ;;  %466 = vrot.lane.b32.xlu2 %v456_v17, %s1797_s7 }
  0xeb   : > { %460 = vrot.lane.b32.xlu0 %v456_v17, %s1798_s16  ;;  %1344 = vmatmul.msk.bf16.vlgmr.msra.gmra.mxu2 %vm504_vm1, %v456_v17 }
  0xf2   : > { %468 = vrot.lane.b32.xlu1 %v456_v17, %s1799_s20  ;;  %462 = vrot.lane.b32.xlu2 %v456_v17, %s1796_s11 }
  0xf3   : > { %479 = vrot.lane.b32.xlu0 %v457_v12, %s1800_s3 }
  0xfa   : > { %485 = vrot.lane.b32.xlu1 %v457_v12, %s1801_s4  ;;  %487 = vrot.lane.b32.xlu2 %v457_v12, %s1802_s25 }
  0xfb   : > { %464 = vrot.lane.b32.xlu0 %v456_v17, %s1800_s3 }
 0x102   : > { %472 = vrot.lane.b32.xlu1 %v456_v17, %s1802_s25  ;;  %452 = vrot.lane.b32.xlu2 %v1484_v18, %s1803_s2 }
 0x103   : > { %470 = vrot.lane.b32.xlu0 %v456_v17, %s1801_s4 }
 0x13c   : > { %v478_v19 = vpop.permute.xlu2 %477 }
 0x13d   : > { %v547_v20 = vsel %vm504_vm1, %v478_v19, 0 }
 0x13e   : > { %556 = vmatpush.bf16.xpose.msrb.mxu0 %v547_v20 }
 0x144   : > { %v467_v21 = vpop.permute.xlu2 %466 }
 0x14c   : > { %v463_v22 = vpop.permute.xlu2 %462 }
 0x14d   : > { %1346 = vmatmul.msk.bf16.vlgmr.msrb.gmra.mxu0 %vm504_vm1, %v463_v22 }
 0x154   : > { %v482_v23 = vpop.permute.xlu1 %481  ;;  %v488_v24 = vpop.permute.xlu2 %487 }
 0x155   : > { %v476_v25 = vpop.permute.xlu0 %475  ;;  %v585_v26 = vsel %vm504_vm1, %v482_v23, 0  ;;  %v642_v37 = vsel %vm504_vm1, %v488_v24, 0 }
 0x156   : > { %v528_v27 = vsel %vm504_vm1, %v476_v25, 0  ;;  %594 = vmatpush.bf16.xpose.msrb.mxu2 %v585_v26 }
 0x157   : > { %537 = vmatpush.bf16.xpose.msra.mxu3 %v528_v27 }
 0x15c   : > { %v484_v28 = vpop.permute.xlu1 %483  ;;  %v453_v29 = vpop.permute.xlu2 %452 }
 0x15d   : > { %v455_v30 = vadd.f32 %v453_v29, %v444_v9  ;;  %v461_v31 = vpop.permute.xlu0 %460  ;;  %1348 = vmatmul.msk.bf16.vlgmr.msrb.gmra.mxu2 %vm504_vm1, %v467_v21  ;;  %v604_v32 = vsel %vm504_vm1, %v484_v28, 0 }
 0x15e   : > { %1345 = vmatmul.msk.bf16.vlgmr.msra.gmra.mxu3 %vm504_vm1, %v461_v31 }
 0x15f   : > { %v2040_v33 = vpack.c.bf16 %v455_v30, %v455_v30  ;;  %613 = vmatpush.bf16.xpose.msrb.mxu3 %v604_v32 }
 0x161   : > { %492 = vrot.lane.b32.xlu1 %v2040_v33, %s1796_s11  ;;  %490 = vrot.lane.b32.xlu2 %v2040_v33, %s1798_s16  ;;  %v754_v7 = vunpack.c.l.b16 %v2040_v33 }
 0x162   : > { %496 = vrot.lane.b32.xlu0 %v2040_v33, %s1797_s7 }
 0x163   : > { %v755_v10 = vpack.c.b16 %v754_v7, %v754_v7 }
 0x164   : > { %v469_v34 = vpop.permute.xlu1 %468 }
 0x165   : > { %v480_v35 = vpop.permute.xlu0 %479 }
 0x166   : > { %v566_v36 = vsel %vm504_vm1, %v480_v35, 0 }
 0x167   : > { %575 = vmatpush.bf16.xpose.msrb.mxu1 %v566_v36 }
 0x169   : > { %494 = vrot.lane.b32.xlu1 %v2040_v33, %s1800_s3 }
 0x16a   : > { %498 = vrot.lane.b32.xlu0 %v2040_v33, %s1799_s20 }
 0x16c   : > { %v486_v38 = vpop.permute.xlu1 %485 }
 0x16d   : > { %v623_v39 = vsel %vm504_vm1, %v486_v38, 0  ;;  %v465_v40 = vpop.permute.xlu0 %464 }
 0x16e   : > { %v520_v41 = vpop.f32.mrf.mxu2  ;;  %1347 = vmatmul.msk.bf16.vlgmr.msrb.gmra.mxu1 %vm504_vm1, %v465_v40  ;;  %1349 = vmatmul.msk.bf16.vlgmr.msrb.gmra.mxu3 %vm504_vm1, %v469_v34 }
 0x16f   : > { %651 = vmatpush.bf16.xpose.msra.mxu1 %v642_v37  ;;  %632 = vmatpush.bf16.xpose.msra.mxu0 %v623_v39  ;;  %v658_v45 = vsel %vm657_vm2, %v520_v41, -inf }
 0x171   : > { %500 = vrot.lane.b32.xlu1 %v2040_v33, %s1801_s4 }
 0x172   : > { %502 = vrot.lane.b32.xlu0 %v2040_v33, %s1802_s25 }
 0x174   : > { %v473_v44 = vpop.permute.xlu1 %472 }
 0x175   : > { %v471_v42 = vpop.permute.xlu0 %470 }
 0x176   : > { %v522_v43 = vpop.f32.mrf.mxu2  ;;  %1350 = vmatmul.msk.bf16.vlgmr.msra.gmra.mxu0 %vm504_vm1, %v471_v42 }
 0x17e   : > { %1351 = vmatmul.msk.bf16.vlgmr.msra.gmra.mxu1 %vm504_vm1, %v473_v44 }
 0x19c   : > { %659 = vmax.xlane.f32.xlu0 %v658_v45 }
 0x1bb   : > { %v491_v14 = vpop.permute.xlu2 %490 }
 0x1bc   : > { %v778_v15 = vunpack.c.l.b16 %v491_v14 }
 0x1be   : > { %v779_v17 = vpack.c.b16 %v778_v15, %v778_v15 }
 0x1ca   : > { %v558_v46 = vpop.f32.mrf.mxu0 }
 0x1cb   : > { %v664_v47 = vsel %vm657_vm2, %v558_v46, -inf }
 0x1cc   : > { %665 = vmax.xlane.f32.xlu2 %v664_v47 }
 0x1d2   : > { %v560_v48 = vpop.f32.mrf.mxu0 }
 0x1d3   : > { %v493_v16 = vpop.permute.xlu1 %492 }
 0x1d4   : > { %v2079_v58 = vpop.permute.xlu0 %496  ;;  %v801_v18 = vunpack.c.l.b16 %v493_v16 }
 0x1d6   : > { %v802_v22 = vpack.c.b16 %v801_v18, %v801_v18 }
 0x1db   : > { %v495_v23 = vpop.permute.xlu1 %494 }
 0x1dc   : > { %v499_v2 = vpop.permute.xlu0 %498  ;;  %v824_v24 = vunpack.c.l.b16 %v495_v23 }
 0x1dd   : > { %v870_v28 = vunpack.c.l.b16 %v499_v2 }
 0x1de   : > { %v825_v26 = vpack.c.b16 %v824_v24, %v824_v24 }
 0x1df   : > { %v871_v29 = vpack.c.b16 %v870_v28, %v870_v28 }
 0x1e0   : > { %v2065_v49 = vpop.f32.mrf.mxu2 }
 0x1e1   : > { %v2067_v50 = vpop.f32.mrf.mxu3  ;;  %v670_v51 = vsel %vm657_vm2, %v2065_v49, -inf }
 0x1e2   : > { %v661_v52 = vsel %vm657_vm2, %v2067_v50, -inf  ;;  %671 = vmax.xlane.f32.xlu2 %v670_v51 }
 0x1e3   : > { %662 = vmax.xlane.f32.xlu1 %v661_v52  ;;  %v501_v30 = vpop.permute.xlu1 %500 }
 0x1e4   : > { %v2089_v5 = vpop.permute.xlu0 %502  ;;  %v893_v33 = vunpack.c.l.b16 %v501_v30 }
 0x1e6   : > { %v894_v35 = vpack.c.b16 %v893_v33, %v893_v33 }
 0x1e8   : > { %v598_v53 = vpop.f32.mrf.mxu2 }
 0x1e9   : > { %v541_v54 = vpop.f32.mrf.mxu3 }
 0x1eb   : > { %v2073_v55 = vpop.f32.mrf.mxu1 }
 0x1ec   : > { %v667_v56 = vsel %vm657_vm2, %v2073_v55, -inf }
 0x1ed   : > { %668 = vmax.xlane.f32.xlu0 %v667_v56  ;;  %v916_v56 = vunpack.c.l.b16 %v2089_v5 }
 0x1f1   : > { %v2077_v57 = vpop.f32.mrf.mxu3 }
 0x1f2   : > { %v673_v13 = vsel %vm657_vm2, %v2077_v57, -inf }
 0x1f3   : > { %v579_v59 = vpop.f32.mrf.mxu1  ;;  %v2081_v60 = vpop.f32.mrf.mxu0 }
 0x1f4   : > { %v676_v61 = vsel %vm657_vm2, %v2081_v60, -inf  ;;  %v917_v59 = vpack.c.b16 %v916_v56, %v916_v56 }
 0x1f5   : > { %677 = vmax.xlane.f32.xlu0 %v676_v61 }
 0x1f9   : > { %v617_v62 = vpop.f32.mrf.mxu3 }
 0x1fb   : > { %v636_v63 = vpop.f32.mrf.mxu0  ;;  %v2085_v0 = vpop.f32.mrf.mxu1 }
 0x1fc   : > { %v679_v1 = vsel %vm657_vm2, %v2085_v0, -inf }
 0x1fd   : > { %680 = vmax.xlane.f32.xlu2 %v679_v1 }
 0x203   : > { %v655_v3 = vpop.f32.mrf.mxu1 }
 0x20f   : > { %v660_v6 = vpop.xlane.xlu0 %659 }
 0x210   : > { %v682_v8 = vsub.f32 %v520_v41, %v660_v6 }
 0x212   : > { %v690_v9 = vmul.f32 1.442695, %v682_v8 }
 0x214   : > { %1488 = vpow2.f32 %v690_v9  ;;  %v847_v9 = vunpack.c.l.b16 %v2079_v58 }
 0x215   : > { %756 = vrot.lane.b32.xlu2 %v755_v10, %s1804_s8 }
 0x216   : > { %v848_v10 = vpack.c.b16 %v847_v9, %v847_v9 }
 0x21a   : > { %v2093_v11 = vpop.eup %1488 }
 0x21b   : > { %v706_v12 = vsel %vm657_vm2, %v2093_v11, 0.0 }
 0x21c   : > { %707 = vadd.xlane.f32.xlu1 %v706_v12 }
 0x224   : > { %674 = vmax.xlane.f32.xlu1 %v673_v13 }
 0x23d   : > { %780 = vrot.lane.b32.xlu1 %v779_v17, %s1804_s8 }
 0x23f   : > { %v666_v19 = vpop.xlane.xlu2 %665 }
 0x240   : > { %v684_v20 = vsub.f32 %v558_v46, %v666_v19 }
 0x242   : > { %v694_v21 = vmul.f32 1.442695, %v684_v20 }
 0x244   : > { %1490 = vpow2.f32 %v694_v21 }
 0x245   : > { %803 = vrot.lane.b32.xlu1 %v802_v22, %s1804_s8 }
 0x24a   : > { %v2101_v25 = vpop.eup %1490 }
 0x24b   : > { %v712_v27 = vsel %vm657_vm2, %v2101_v25, 0.0 }
 0x24c   : > { %713 = vadd.xlane.f32.xlu0 %v712_v27 }
 0x24d   : > { %826 = vrot.lane.b32.xlu1 %v825_v26, %s1804_s8 }
 0x255   : > { %872 = vrot.lane.b32.xlu1 %v871_v29, %s1804_s8  ;;  %v672_v31 = vpop.xlane.xlu2 %671 }
 0x256   : > { %v686_v32 = vsub.f32 %v2065_v49, %v672_v31  ;;  %v663_v37 = vpop.xlane.xlu1 %662 }
 0x257   : > { %v683_v41 = vsub.f32 %v2067_v50, %v663_v37 }
 0x258   : > { %v698_v34 = vmul.f32 1.442695, %v686_v32 }
 0x259   : > { %v692_v43 = vmul.f32 1.442695, %v683_v41 }
 0x25a   : > { %1492 = vpow2.f32 %v698_v34 }
 0x25d   : > { %895 = vrot.lane.b32.xlu1 %v894_v35, %s1804_s8 }
 0x260   : > { %v2109_v36 = vpop.eup %1492  ;;  %v669_v38 = vpop.xlane.xlu0 %668 }
 0x261   : > { %v685_v39 = vsub.f32 %v2073_v55, %v669_v38  ;;  %v718_v40 = vsel %vm657_vm2, %v2109_v36, 0.0 }
 0x262   : > { %719 = vadd.xlane.f32.xlu2 %v718_v40 }
 0x263   : > { %v696_v42 = vmul.f32 1.442695, %v685_v39 }
 0x265   : > { %1494 = vpow2.f32 %v696_v42 }
 0x266   : > { %1496 = vpow2.f32 %v692_v43 }
 0x268   : > { %v678_v44 = vpop.xlane.xlu0 %677 }
 0x269   : > { %v688_v45 = vsub.f32 %v2081_v60, %v678_v44 }
 0x26b   : > { %v2116_v46 = vpop.eup %1494  ;;  %v702_v47 = vmul.f32 1.442695, %v688_v45 }
 0x26c   : > { %v715_v48 = vsel %vm657_vm2, %v2116_v46, 0.0  ;;  %v2120_v51 = vpop.eup %1496 }
 0x26d   : > { %1498 = vpow2.f32 %v702_v47  ;;  %716 = vadd.xlane.f32.xlu0 %v715_v48  ;;  %v709_v50 = vsel %vm657_vm2, %v2120_v51, 0.0  ;;  %v947_v47 = vld [vmem:[#allocation10] sm:$0x3]  ;;  %v949_v48 = vld [vmem:[#allocation10 + $0x4] sm:$0x3] }
 0x270   : > { %v681_v49 = vpop.xlane.xlu2 %680 }
 0x271   : > { %v689_v20 = vsub.f32 %v2085_v0, %v681_v49 }
 0x273   : > { %v2122_v52 = vpop.eup %1498  ;;  %v704_v22 = vmul.f32 1.442695, %v689_v20 }
 0x274   : > { %v724_v53 = vsel %vm657_vm2, %v2122_v52, 0.0 }
 0x275   : > { %710 = vadd.xlane.f32.xlu0 %v709_v50  ;;  %725 = vadd.xlane.f32.xlu2 %v724_v53  ;;  %v960_v50 = vsel %vm958_vm4, %v947_v47, 0 }
 0x278   : > { %v757_v54 = vpop.permute.xlu2 %756 }
 0x279   : > { %v763_v55 = vsel %vm761_vm3, %v757_v54, 0 }
 0x27a   : > { %772 = vmatpush.bf16.msra.mxu2 %v763_v55 }
 0x28d   : > { %918 = vrot.lane.b32.xlu2 %v917_v59, %s1804_s8 }
 0x28f   : > { %v708_v60 = vpop.xlane.xlu1 %707 }
 0x290   : > { %1500 = vrcp.f32 %v708_v60  ;;  %v950_v60 = vld [vmem:[#allocation10 + $0x6] sm:$0x3] }
 0x296   : > { %v1501_v61 = vpop.eup %1500 }
 0x297   : > { %v738_v62 = vmul.f32 %v1501_v61, %v2093_v11  ;;  %v675_v63 = vpop.xlane.xlu1 %674 }
 0x298   : > { %v687_v1 = vsub.f32 %v2077_v57, %v675_v63 }
 0x299   : > { %v746_v2 = vpack.c.bf16 %v738_v62, %v738_v62  ;;  %v953_v62 = vld [vmem:[#allocation10 + $0xc] sm:$0x3] }
 0x29a   : > { %v700_v3 = vmul.f32 1.442695, %v687_v1  ;;  %v1074_v63 = vsel %vm958_vm4, %v953_v62, 0 }
 0x29b   : > { %1352 = vmatmul.msk.bf16.vlgmr.msra.gmra.mxu2 %vm657_vm2, %v746_v2  ;;  %v948_v2 = vld [vmem:[#allocation10 + $0x2] sm:$0x3] }
 0x29c   : > { %1502 = vpow2.f32 %v700_v3  ;;  %v979_v3 = vsel %vm958_vm4, %v948_v2, 0 }
 0x2a2   : > { %v1503_v6 = vpop.eup %1502 }
 0x2a3   : > { %v721_v7 = vsel %vm657_vm2, %v1503_v6, 0.0 }
 0x2a4   : > { %722 = vadd.xlane.f32.xlu0 %v721_v7 }
 0x2af   : > { %v781_v5 = vpop.permute.xlu1 %780 }
 0x2b0   : > { %v786_v8 = vsel %vm761_vm3, %v781_v5, 0 }
 0x2b1   : > { %795 = vmatpush.bf16.msra.mxu3 %v786_v8 }
 0x2b7   : > { %v804_v11 = vpop.permute.xlu1 %803 }
 0x2b8   : > { %v809_v12 = vsel %vm761_vm3, %v804_v11, 0  ;;  %849 = vrot.lane.b32.xlu0 %v848_v10, %s1804_s8 }
 0x2b9   : > { %818 = vmatpush.bf16.msrb.mxu0 %v809_v12 }
 0x2bf   : > { %v827_v57 = vpop.permute.xlu1 %826  ;;  %v714_v13 = vpop.xlane.xlu0 %713 }
 0x2c0   : > { %v832_v14 = vsel %vm761_vm3, %v827_v57, 0  ;;  %1504 = vrcp.f32 %v714_v13 }
 0x2c1   : > { %841 = vmatpush.bf16.msrb.mxu1 %v832_v14  ;;  %1506 = vpow2.f32 %v704_v22  ;;  %v954_v22 = vld [vmem:[#allocation10 + $0xe] sm:$0x3] }
 0x2c6   : > { %v1505_v15 = vpop.eup %1504 }
 0x2c7   : > { %v740_v16 = vmul.f32 %v1505_v15, %v2101_v25  ;;  %v873_v17 = vpop.permute.xlu1 %872  ;;  %v2145_v23 = vpop.eup %1506 }
 0x2c8   : > { %v878_v18 = vsel %vm761_vm3, %v873_v17, 0  ;;  %v727_v25 = vsel %vm657_vm2, %v2145_v23, 0.0 }
 0x2c9   : > { %v748_v58 = vpack.c.bf16 %v740_v16, %v740_v16  ;;  %887 = vmatpush.bf16.msrb.mxu3 %v878_v18  ;;  %v952_v16 = vld [vmem:[#allocation10 + $0xa] sm:$0x3]  ;;  %v951_v18 = vld [vmem:[#allocation10 + $0x8] sm:$0x3] }
 0x2ca   : > { %v1055_v17 = vsel %vm958_vm4, %v952_v16, 0 }
 0x2cb   : > { %1354 = vmatmul.msk.bf16.vlgmr.msrb.gmra.mxu0 %vm657_vm2, %v748_v58  ;;  %v1036_v58 = vsel %vm958_vm4, %v951_v18, 0 }
 0x2cf   : > { %v896_v19 = vpop.permute.xlu1 %895 }
 0x2d0   : > { %v901_v21 = vsel %vm761_vm3, %v896_v19, 0 }
 0x2d1   : > { %910 = vmatpush.bf16.msra.mxu0 %v901_v21 }
 0x2d5   : > { %v720_v24 = vpop.xlane.xlu2 %719 }
 0x2e0   : > { %v717_v26 = vpop.xlane.xlu0 %716 }
 0x2e1   : > { %1508 = vrcp.f32 %v717_v26 }
 0x2e2   : > { %728 = vadd.xlane.f32.xlu0 %v727_v25 }
 0x2e7   : > { %v1509_v27 = vpop.eup %1508 }
 0x2e8   : > { %v741_v28 = vmul.f32 %v1509_v27, %v2116_v46  ;;  %v711_v29 = vpop.xlane.xlu0 %710  ;;  %v726_v30 = vpop.xlane.xlu2 %725 }
 0x2e9   : > { %1510 = vrcp.f32 %v711_v29 }
 0x2ea   : > { %v749_v0 = vpack.c.bf16 %v741_v28, %v741_v28  ;;  %1512 = vrcp.f32 %v726_v30 }
 0x2ec   : > { %1355 = vmatmul.msk.bf16.vlgmr.msrb.gmra.mxu1 %vm657_vm2, %v749_v0 }
 0x2ef   : > { %v1511_v31 = vpop.eup %1510 }
 0x2f0   : > { %v1513_v32 = vpop.eup %1512  ;;  %v739_v33 = vmul.f32 %v1511_v31, %v2120_v51  ;;  %v919_v34 = vpop.permute.xlu2 %918  ;;  %v998_v51 = vsel %vm958_vm4, %v949_v48, 0 }
 0x2f1   : > { %v744_v35 = vmul.f32 %v1513_v32, %v2122_v52  ;;  %v924_v37 = vsel %vm761_vm3, %v919_v34, 0  ;;  %1007 = vmatpush.bf16.msrb.mxu0 %v998_v51 }
 0x2f2   : > { %v747_v38 = vpack.c.bf16 %v739_v33, %v739_v33  ;;  %933 = vmatpush.bf16.msra.mxu1 %v924_v37 }
 0x2f3   : > { %v752_v39 = vpack.c.bf16 %v744_v35, %v744_v35 }
 0x2f4   : > { %1353 = vmatmul.msk.bf16.vlgmr.msra.gmra.mxu3 %vm657_vm2, %v747_v38 }
 0x2f5   : > { %1358 = vmatmul.msk.bf16.vlgmr.msra.gmra.mxu0 %vm657_vm2, %v752_v39  ;;  %988 = vmatpush.bf16.msra.mxu3 %v979_v3  ;;  %v1805_v3 = vmov 32.0  }
 0x2f6   : > { %1083 = vmatpush.bf16.msra.mxu0 %v1074_v63 }
 0x317   : > { %v723_v40 = vpop.xlane.xlu0 %722 }
 0x318   : > { %1514 = vrcp.f32 %v723_v40 }
 0x319   : > { %1516 = vrcp.f32 %v720_v24 }
 0x31e   : > { %v1515_v41 = vpop.eup %1514  ;;  %v774_v42 = vpop.f32.mrf.mxu2 }
 0x31f   : > { %v743_v43 = vmul.f32 %v1515_v41, %v1503_v6  ;;  %v1517_v45 = vpop.eup %1516  ;;  %v939_v55 = vpack.c.bf16 %v774_v42, %v774_v42 }
 0x320   : > { %v742_v49 = vmul.f32 %v1517_v45, %v2109_v36  ;;  %v1017_v36 = vsel %vm958_vm4, %v950_v60, 0  ;;  %v1485_v60 = vld [vmem:[#allocation11 + $0x3] ss:$0 sm:$0xff] }
 0x321   : > { %v751_v44 = vpack.c.bf16 %v743_v43, %v743_v43  ;;  %1026 = vmatpush.bf16.msrb.mxu1 %v1017_v36 }
 0x322   : > { %v750_v54 = vpack.c.bf16 %v742_v49, %v742_v49 }
 0x323   : > { %1357 = vmatmul.msk.bf16.vlgmr.msrb.gmra.mxu3 %vm657_vm2, %v751_v44 }
 0x324   : > { %1064 = vmatpush.bf16.msrb.mxu3 %v1055_v17 }
 0x326   : > { %v776_v46 = vpop.f32.mrf.mxu2 }
 0x32a   : > { %v850_v52 = vpop.permute.xlu0 %849 }
 0x32b   : > { %v855_v53 = vsel %vm761_vm3, %v850_v52, 0 }
 0x32c   : > { %864 = vmatpush.bf16.msrb.mxu2 %v855_v53 }
 0x32f   : > { %1356 = vmatmul.msk.bf16.vlgmr.msrb.gmra.mxu2 %vm657_vm2, %v750_v54 }
 0x330   : > { %969 = vmatpush.bf16.msra.mxu2 %v960_v50 }
 0x334   : > { %1045 = vmatpush.bf16.msrb.mxu2 %v1036_v58 }
 0x33f   : > { %1360 = vmatmul.msk.bf16.vlgmr.msra.gmra.mxu2 %vm504_vm1, %v939_v55 }
 0x348   : > { %v820_v56 = vpop.f32.mrf.mxu0 }
 0x349   : > { %v941_v59 = vpack.c.bf16 %v820_v56, %v820_v56 }
 0x34b   : > { %1362 = vmatmul.msk.bf16.vlgmr.msrb.gmra.mxu0 %vm504_vm1, %v941_v59 }
 0x350   : > { %v822_v61 = vpop.f32.mrf.mxu0 }
 0x355   : > { %v729_v1 = vpop.xlane.xlu0 %728 }
 0x356   : > { %1518 = vrcp.f32 %v729_v1 }
 0x357   : > { %1520 = vrcp.f32 %v1805_v3 }
 0x35c   : > { %v1519_v6 = vpop.eup %1518 }
 0x35d   : > { %v745_v7 = vmul.f32 %v1519_v6, %v2145_v23  ;;  %v1093_v23 = vsel %vm958_vm4, %v954_v22, 0  ;;  %v1521_v6 = vpop.eup %1520  ;;  %v1486_v22 = vld [vmem:[#allocation11 + $0x4] ss:$0 sm:$0xff] }
 0x35e   : > { %vm1134_vm5 = vweird.f32 %v1521_v6 }
 0x35f   : > { %v753_v5 = vpack.c.bf16 %v745_v7, %v745_v7  ;;  %v1130_v7 = vmul.f32 32.0, %v1521_v6 }
 0x361   : > { %1359 = vmatmul.msk.bf16.vlgmr.msra.gmra.mxu1 %vm657_vm2, %v753_v5  ;;  %v1131_v5 = vsub.f32 1.0, %v1130_v7 }
 0x362   : > { %1102 = vmatpush.bf16.msra.mxu1 %v1093_v23 }
 0x369   : > { %v843_v8 = vpop.f32.mrf.mxu1 }
 0x36a   : > { %v942_v9 = vpack.c.bf16 %v843_v8, %v843_v8  ;;  %v1132_v8 = vmul.f32 %v1521_v6, %v1131_v5 }
 0x371   : > { %v845_v10 = vpop.f32.mrf.mxu1  ;;  %1363 = vmatmul.msk.bf16.vlgmr.msrb.gmra.mxu1 %vm504_vm1, %v942_v9  ;;  %v1133_v9 = vadd.f32 %v1521_v6, %v1132_v8 }
 0x372   : > { %v912_v11 = vpop.f32.mrf.mxu0 }
 0x373   : > { %v945_v12 = vpack.c.bf16 %v912_v11, %v912_v11  ;;  %v1135_v10 = vsel %vm1134_vm5, %v1521_v6, %v1133_v9 }
 0x375   : > { %1366 = vmatmul.msk.bf16.vlgmr.msra.gmra.mxu0 %vm504_vm1, %v945_v12 }
 0x377   : > { %v797_v57 = vpop.f32.mrf.mxu3 }
 0x378   : > { %v940_v13 = vpack.c.bf16 %v797_v57, %v797_v57 }
 0x37a   : > { %v914_v14 = vpop.f32.mrf.mxu0  ;;  %1361 = vmatmul.msk.bf16.vlgmr.msra.gmra.mxu3 %vm504_vm1, %v940_v13 }
 0x37f   : > { %v799_v15 = vpop.f32.mrf.mxu3 }
 0x3a6   : > { %v889_v19 = vpop.f32.mrf.mxu3 }
 0x3a7   : > { %v944_v20 = vpack.c.bf16 %v889_v19, %v889_v19 }
 0x3a9   : > { %1365 = vmatmul.msk.bf16.vlgmr.msrb.gmra.mxu3 %vm504_vm1, %v944_v20 }
 0x3ae   : > { %v891_v21 = vpop.f32.mrf.mxu3 }
 0x3b2   : > { %v866_v24 = vpop.f32.mrf.mxu2 }
 0x3b3   : > { %v943_v26 = vpack.c.bf16 %v866_v24, %v866_v24 }
 0x3b5   : > { %1364 = vmatmul.msk.bf16.vlgmr.msrb.gmra.mxu2 %vm504_vm1, %v943_v26  ;;  %v1487_v26 = vld [vmem:[#allocation11 + $0x5] ss:$0 sm:$0xff] }
 0x3ba   : > { %v868_v25 = vpop.f32.mrf.mxu2 }
 0x3c2   : > { %v971_v27 = vpop.f32.mrf.mxu2 }
 0x3c3   : > { %v1108_v39 = vsel %vm398_vm0, %v971_v27, 0.0 }
 0x3c8   : > { %v1009_v28 = vpop.f32.mrf.mxu0 }
 0x3c9   : > { %v1111_v42 = vsel %vm398_vm0, %v1009_v28, 0.0 }
 0x3ca   : > { %v973_v29 = vpop.f32.mrf.mxu2 }
 0x3d0   : > { %v1011_v30 = vpop.f32.mrf.mxu0 }
 0x3de   : > { %v935_v0 = vpop.f32.mrf.mxu1 }
 0x3df   : > { %v946_v31 = vpack.c.bf16 %v935_v0, %v935_v0 }
 0x3e1   : > { %1367 = vmatmul.msk.bf16.vlgmr.msra.gmra.mxu1 %vm504_vm1, %v946_v31 }
 0x3e6   : > { %v937_v32 = vpop.f32.mrf.mxu1 }
 0x3ee   : > { %v1028_v33 = vpop.f32.mrf.mxu1 }
 0x3ef   : > { %v1113_v44 = vsel %vm398_vm0, %v1028_v33, 0.0 }
 0x3f2   : > { %v1085_v34 = vpop.f32.mrf.mxu0 }
 0x3f3   : > { %v1119_v54 = vsel %vm398_vm0, %v1085_v34, 0.0 }
 0x3f6   : > { %v1030_v35 = vpop.f32.mrf.mxu1 }
 0x3fa   : > { %v1087_v37 = vpop.f32.mrf.mxu0 }
 0x3fd   : > { %v990_v38 = vpop.f32.mrf.mxu3 }
 0x3fe   : > { %v1109_v40 = vsel %vm398_vm0, %v990_v38, 0.0 }
 0x3ff   : > { %v1110_v41 = vadd.f32 %v1109_v40, %v1108_v39 }
 0x401   : > { %v1112_v43 = vadd.f32 %v1111_v42, %v1110_v41 }
 0x403   : > { %v1114_v45 = vadd.f32 %v1113_v44, %v1112_v43 }
 0x405   : > { %v992_v46 = vpop.f32.mrf.mxu3 }
 0x42c   : > { %v1066_v47 = vpop.f32.mrf.mxu3 }
 0x42d   : > { %v1117_v50 = vsel %vm398_vm0, %v1066_v47, 0.0 }
 0x434   : > { %v1068_v48 = vpop.f32.mrf.mxu3 }
 0x438   : > { %v1047_v49 = vpop.f32.mrf.mxu2 }
 0x439   : > { %v1115_v51 = vsel %vm398_vm0, %v1047_v49, 0.0 }
 0x43a   : > { %v1116_v52 = vadd.f32 %v1115_v51, %v1114_v45 }
 0x43c   : > { %v1118_v53 = vadd.f32 %v1117_v50, %v1116_v52 }
 0x43e   : > { %v1120_v55 = vadd.f32 %v1119_v54, %v1118_v53 }
 0x440   : > { %v1049_v56 = vpop.f32.mrf.mxu2 }
 0x45e   : > { %v1104_v59 = vpop.f32.mrf.mxu1 }
 0x45f   : > { %v1121_v36 = vsel %vm398_vm0, %v1104_v59, 0.0 }
 0x460   : > { %v1122_v61 = vadd.f32 %v1121_v36, %v1120_v55 }
 0x462   : > { %v1124_v62 = vadd.f32 %v1485_v60, %v1122_v61 }
 0x464   : > { %v1125_v63 = vadd.f32 %v1124_v62, %v2011_v4 }
 0x466   : > { %v1106_v1 = vpop.f32.mrf.mxu1  ;;  %v1126_v2 = vsel %vm398_vm0, %v1125_v63, 0.0 }
 0x467   : > { %1127 = vadd.xlane.f32.xlu1 %v1126_v2 }
 0x4da   : > { %v1128_v11 = vpop.xlane.xlu1 %1127 }
 0x4db   : > { %v1136_v12 = vmul.f32 %v1135_v10, %v1128_v11 }
 0x4dd   : > { %v1137_v57 = vsub.f32 %v1125_v63, %v1136_v12 }
 0x4df   : > { %v1138_v13 = vmul.f32 %v1137_v57, %v1137_v57 }
 0x4e1   : > { %v1139_v4 = vsel %vm398_vm0, %v1138_v13, 0.0 }
 0x4e2   : > { %1140 = vadd.xlane.f32.xlu2 %v1139_v4 }
 0x555   : > { %v1141_v14 = vpop.xlane.xlu2 %1140 }
 0x556   : > { %v1142_v15 = vmul.f32 %v1141_v14, %v1135_v10 }
 0x558   : > { %v1143_v16 = vadd.f32 1e-05, %v1142_v15 }
 0x55a   : > { %1522 = vrsqrt.f32 %v1143_v16  ;;  %vm1150_vm7 = vweird.f32 %v1143_v16 }
 0x560   : > { %v1523_v17 = vpop.eup %1522 }
 0x561   : > { %v1145_v18 = vmul.f32 %v1523_v17, %v1143_v16  ;;  %vm1151_vm6 = vweird.f32 %v1523_v17 }
 0x562   : > { %vm1152_vm8 = vmor %vm1150_vm7, %vm1151_vm6 }
 0x563   : > { %v1146_v58 = vmul.f32 %v1523_v17, %v1145_v18 }
 0x565   : > { %v1147_v19 = vmul.f32 0.5, %v1146_v58 }
 0x567   : > { %v1148_v20 = vsub.f32 1.5, %v1147_v19 }
 0x569   : > { %v1149_v21 = vmul.f32 %v1523_v17, %v1148_v20 }
 0x56b   : > { %v1153_v23 = vsel %vm1152_vm8, %v1523_v17, %v1149_v21 }
 0x56c   : > { %v1154_v24 = vmul.f32 %v1153_v23, %v1137_v57 }
 0x56e   : > { %v1156_v25 = vmul.f32 %v1486_v22, %v1154_v24 }
 0x570   : > { %v1158_v27 = vadd.f32 %v1487_v26, %v1156_v25 }
 0x572   : > { %1159 = vst.msk [vmem:[%s371_s17] sm:$0xff] %vm398_vm0, %v1158_v27 }
 0x573   : > { %1731 = shalt.err (!%p1728_p8)
}
 0x574   : > { %1396 = dma.vmem_to_hbm [thread:$0]  (%p1930_p4), %s1174_s29, 128, %s1176_s14, %s1161_s28  }
 0x575 PF: > { %s1187_s5 = sand.u32 1, %s1774_s21   ;;  %p2248_p10 = scmp.ge.s32.totalorder %s1786_s24, 2 }
 0x576   : > { %s1188_s3 = scalar_lea.sflag [#allocation4], %s1187_s5 }
 0x577   : > { %p1419_p13 = pnand %p2248_p10, %p1934_p6 }
 0x579   : > { %p1420_p11 = pneg %p1419_p13 }
 0x57b   : > { %1769 = dma.done.wait (%p1420_p11), %s1188_s3, 128  }
 0x57c   : > { %1771 = vsyncadd (%p1420_p11), %s1188_s3, 4294967168  ;;  %s2249_s4 = sld [smem:[#allocation20_spill]]  ;;  %p24_p0 = scmp.ge.s32.totalorder %s1902_s12, 4  }
 0x57d   : > { %s2250_s21 = smov %s1778_s22  ;;  %s2251_s22 = smov %s1782_s23 }
 0x57e   : > { %s2253_s24 = smov %s1902_s12  ;;  %26 = sbr.rel (!%p24_p0) target bundleno = 14 (0xe), region = 118 }
 0x582   : > { %s2252_s23 = smov %s2249_s4 }
 0x583   :  { %1194 = vsyncpa [#allocation3], 1 }
 0x584   :  { %1196 = vsyncpa [#allocation3 + $0x1], 1 }
 0x585   :  { %1197 = vsyncpa [#allocation6], 1 }
 0x586   :  { %1199 = vsyncpa [#allocation6 + $0x1], 1 }
 0x587   :  { %1200 = vsyncpa [#allocation9], 1 }
 0x588   :  { %1201 = vsyncpa [#allocation12], 1 }
 0x589   :  { %1202 = vsyncpa [#allocation4], 1 }
 0x58a   :  { %1204 = vsyncpa [#allocation4 + $0x1], 1 }

</bundles_post_ra>
